<compile_context>
chip_gen: v7x
topology: tpu7x:2x2x1
jax: 0.10.0
libtpu: 0.0.40
codegen_flags: <defaults>
</compile_context>

<pallas_src>
import functools

import jax
import jax.numpy as jnp
from jax.experimental import pallas as pl
from jax.experimental.pallas import tpu as pltpu


def _focal_loss_kernel(x_ref, t_ref, out_ref, *, gamma, alpha, hw, tile_hw):
    """One grid step processes a (C, tile_hw) lane-dense slab of logits.

    x_ref  : (1, C, tile_hw)  logits (any float dtype; cast to f32 in VMEM)
    t_ref  : (1, 1, tile_hw)  int32 class targets
    out_ref: (1, 1, 128)      per-tile partial loss sum (broadcast over lanes)
    """
    j = pl.program_id(1)

    x = x_ref[0].astype(jnp.float32)              # (C, tile_hw)
    tgt = t_ref[0]                                # (1, tile_hw) int32
    n_cls = x.shape[0]

    # numerically stable log-softmax over the class (sublane) axis
    m = jnp.max(x, axis=0, keepdims=True)         # (1, tile_hw)
    z = x - m                                     # (C, tile_hw)
    lse = jnp.log(jnp.sum(jnp.exp(z), axis=0, keepdims=True))   # (1, tile_hw)

    # gather z at the target class via a sublane one-hot
    cls_ids = jax.lax.broadcasted_iota(jnp.int32, (n_cls, tile_hw), 0)
    onehot = (cls_ids == tgt).astype(jnp.float32)                # (C, tile_hw)
    logpt = jnp.sum(onehot * z, axis=0, keepdims=True) - lse     # (1, tile_hw)
    pt = jnp.exp(logpt)

    # alpha is a trace-time constant -> scalar-constant select chain
    if alpha is not None:
        at = jnp.full(tgt.shape, float(alpha[0]), jnp.float32)
        for c in range(1, n_cls):
            at = jnp.where(tgt == c, jnp.float32(alpha[c]), at)
        logpt = logpt * at

    # focal modulation; specialize small integer gammas (avoid float pow)
    one_m_pt = 1.0 - pt
    if gamma == 0.0:
        focal = jnp.ones_like(one_m_pt)
    elif gamma == 1.0:
        focal = one_m_pt
    elif gamma == 2.0:
        focal = one_m_pt * one_m_pt
    else:
        focal = jnp.power(one_m_pt, jnp.float32(gamma))

    loss = -focal * logpt                         # (1, tile_hw)

    # mask lanes past the true HW extent (last tile may be padded)
    lane = jax.lax.broadcasted_iota(jnp.int32, loss.shape, 1)
    valid = (j * tile_hw + lane) < hw
    loss = jnp.where(valid, loss, 0.0)

    out_ref[...] = jnp.full(out_ref.shape, jnp.sum(loss), jnp.float32)


def focal_loss(x, target, gamma=2.0, alpha=None, size_average=True,
               tile_hw=16384):
    """JAX/Pallas equivalent of FocalLoss.forward.

    x:      [B, C, *spatial] logits (bf16 or f32; cast to f32 in-kernel),
            or already [N, C]
    target: [B, *spatial] (or [N] / [N, 1]) integer class labels
    """
    if x.ndim > 2:
        B, C = int(x.shape[0]), int(x.shape[1])
        hw = 1
        for d in x.shape[2:]:
            hw *= int(d)
        x3 = x.reshape(B, C, hw)                       # free reshape, no copy
        t3 = target.reshape(B, 1, hw).astype(jnp.int32)
    else:
        # already [N, C]: rare path, needs one transpose to lane-dense layout
        N, C = int(x.shape[0]), int(x.shape[1])
        B, hw = 1, N
        x3 = x.T.reshape(1, C, N)
        t3 = target.reshape(1, 1, N).astype(jnp.int32)

    # alpha handling (matches the torch module's __init__); trace-time constant
    if alpha is None:
        alpha_t = None
    elif isinstance(alpha, (float, int)):
        assert C == 2, "scalar alpha implies binary classification"
        alpha_t = (float(alpha), 1.0 - float(alpha))
    else:
        alpha_t = tuple(float(a) for a in alpha)
        assert len(alpha_t) == C

    # lane-dense tiling over the pixel axis; big tiles amortize per-step cost
    tile_hw = int(min(int(tile_hw), -(-hw // 128) * 128))
    tile_hw = max(128, -(-tile_hw // 128) * 128)       # multiple of 128
    n_hw = pl.cdiv(hw, tile_hw)
    grid = (B, n_hw)

    kernel = functools.partial(_focal_loss_kernel, gamma=float(gamma),
                               alpha=alpha_t, hw=hw, tile_hw=tile_hw)

    # explicit VMEM budget (fits v7x's 64 MiB as well as v5e/v6e's 128 MiB)
    block_bytes = (C + 1) * tile_hw * 4
    vmem_limit = int(min(48 * 1024 * 1024,
                         max(8 * 1024 * 1024, 6 * block_bytes)))

    partials = pl.pallas_call(
        kernel,
        out_shape=jax.ShapeDtypeStruct((B * n_hw, 1, 128), jnp.float32),
        grid_spec=pltpu.PrefetchScalarGridSpec(
            num_scalar_prefetch=0,
            grid=grid,
            in_specs=[
                pl.BlockSpec((1, C, tile_hw), lambda b, j: (b, 0, j)),
                pl.BlockSpec((1, 1, tile_hw), lambda b, j: (b, 0, j)),
            ],
            out_specs=pl.BlockSpec((1, 1, 128),
                                   lambda b, j: (b * n_hw + j, 0, 0)),
        ),
        compiler_params=pltpu.CompilerParams(
            dimension_semantics=("parallel", "parallel"),
            vmem_limit_bytes=vmem_limit),
    )(x3, t3)

    total = jnp.sum(partials[:, 0, 0])
    if size_average:
        return total / jnp.float32(B * hw)
    return total


def _focal_loss_ref(x, target, gamma=2.0, alpha=None, size_average=True):
    """Pure-JAX reference mirroring the PyTorch module."""
    B, C = x.shape[0], x.shape[1]
    x2d = x.reshape(B, C, -1).transpose(0, 2, 1).reshape(-1, C)
    x2d = x2d.astype(jnp.float32)
    t = target.reshape(-1)
    logsm = jax.nn.log_softmax(x2d, axis=1)
    logpt = jnp.take_along_axis(logsm, t[:, None], axis=1)[:, 0]
    pt = jnp.exp(logpt)
    if alpha is not None:
        if isinstance(alpha, (float, int)):
            a = jnp.array([alpha, 1.0 - alpha], jnp.float32)
        else:
            a = jnp.asarray(alpha, jnp.float32)
        logpt = logpt * a[t]
    loss = -((1.0 - pt) ** gamma) * logpt
    return loss.mean() if size_average else loss.sum()


if __name__ == "__main__":
    key = jax.random.PRNGKey(0)
    kx, kt = jax.random.split(key)

    # Case 1: per-class alpha list, mean reduction, HW multiple of 128.
    B, C, H, W = 2, 4, 16, 16
    x = jax.random.normal(kx, (B, C, H, W), jnp.float32)
    target = jax.random.randint(kt, (B, H, W), 0, C, jnp.int32)
    gamma = 2.0
    alpha = [0.1, 0.2, 0.3, 0.4]

    out1 = jax.block_until_ready(
        focal_loss(x, target, gamma=gamma, alpha=alpha, size_average=True))
    ref1 = _focal_loss_ref(x, target, gamma=gamma, alpha=alpha,
                           size_average=True)
    assert jnp.allclose(out1, ref1, rtol=1e-5, atol=1e-6), (out1, ref1)

    # Case 2: no alpha, sum reduction, ragged HW (exercises masked last tile).
    H2, W2 = 10, 10
    x2 = jax.random.normal(kx, (B, C, H2, W2), jnp.float32)
    t2 = jax.random.randint(kt, (B, H2, W2), 0, C, jnp.int32)
    out2 = jax.block_until_ready(
        focal_loss(x2, t2, gamma=gamma, alpha=None, size_average=False))
    ref2 = _focal_loss_ref(x2, t2, gamma=gamma, alpha=None,
                           size_average=False)
    assert jnp.allclose(out2, ref2, rtol=1e-5, atol=1e-5), (out2, ref2)

    print("KERNEL_OK")
</pallas_src>

<mosaic_0001>
module attributes {stable_mosaic.version = 11 : i64} {
  func.func @_focal_loss_kernel(%arg0: i32, %arg1: i32, %arg2: memref<1x4x256xf32, #tpu.memory_space<vmem>>, %arg3: memref<1x1x256xi32, #tpu.memory_space<vmem>>, %arg4: memref<1x1x128xf32, #tpu.memory_space<vmem>>) attributes {dimension_semantics = [#tpu.dimension_semantics<parallel>, #tpu.dimension_semantics<parallel>], iteration_bounds = array<i64: 2, 1>, scalar_prefetch = 0 : i64, scratch_operands = 0 : i64, tpu.core_type = #tpu.core_type<tc>, window_params = [{transform_indices = @transform_0, window_bounds = array<i64: 1, 4, 256>}, {transform_indices = @transform_1, window_bounds = array<i64: 1, 1, 256>}, {transform_indices = @transform_2, window_bounds = array<i64: 1, 1, 128>}]} {
    %c0 = arith.constant 0 : index
    %c0_0 = arith.constant 0 : index
    %c0_1 = arith.constant 0 : index
    %0 = vector.load %arg2[%c0, %c0_0, %c0_1] : memref<1x4x256xf32, #tpu.memory_space<vmem>>, vector<1x4x256xf32>
    %1 = vector.shape_cast %0 : vector<1x4x256xf32> to vector<4x256xf32>
    %c0_2 = arith.constant 0 : index
    %c0_3 = arith.constant 0 : index
    %c0_4 = arith.constant 0 : index
    %2 = vector.load %arg3[%c0_2, %c0_3, %c0_4] : memref<1x1x256xi32, #tpu.memory_space<vmem>>, vector<1x1x256xi32>
    %3 = vector.shape_cast %2 : vector<1x1x256xi32> to vector<1x256xi32>
    %cst = arith.constant dense<0xFF800000> : vector<256xf32>
    %4 = vector.multi_reduction <maximumf>, %1, %cst [0] : vector<4x256xf32> to vector<256xf32>
    %5 = vector.shape_cast %4 : vector<256xf32> to vector<1x256xf32>
    %6 = vector.broadcast %5 : vector<1x256xf32> to vector<4x256xf32>
    %7 = arith.subf %1, %6 : vector<4x256xf32>
    %8 = math.exp %7 : vector<4x256xf32>
    %cst_5 = arith.constant dense<0.000000e+00> : vector<256xf32>
    %9 = vector.multi_reduction <add>, %8, %cst_5 [0] : vector<4x256xf32> to vector<256xf32>
    %10 = vector.shape_cast %9 : vector<256xf32> to vector<1x256xf32>
    %11 = math.log %10 : vector<1x256xf32>
    %12 = tpu.iota {dimensions = array<i32: 0>} : vector<4x256xi32>
    %13 = vector.broadcast %3 : vector<1x256xi32> to vector<4x256xi32>
    %14 = arith.cmpi eq, %12, %13 : vector<4x256xi32>
    %15 = arith.extui %14 : vector<4x256xi1> to vector<4x256xi32>
    %16 = arith.sitofp %15 : vector<4x256xi32> to vector<4x256xf32>
    %17 = arith.mulf %16, %7 : vector<4x256xf32>
    %cst_6 = arith.constant dense<0.000000e+00> : vector<256xf32>
    %18 = vector.multi_reduction <add>, %17, %cst_6 [0] : vector<4x256xf32> to vector<256xf32>
    %19 = vector.shape_cast %18 : vector<256xf32> to vector<1x256xf32>
    %20 = arith.subf %19, %11 : vector<1x256xf32>
    %21 = math.exp %20 : vector<1x256xf32>
    %cst_7 = arith.constant 1.000000e-01 : f32
    %22 = vector.broadcast %cst_7 : f32 to vector<1x256xf32>
    %c1_i32 = arith.constant 1 : i32
    %23 = vector.broadcast %c1_i32 : i32 to vector<1x256xi32>
    %24 = arith.cmpi eq, %3, %23 : vector<1x256xi32>
    %cst_8 = arith.constant 2.000000e-01 : f32
    %25 = vector.broadcast %cst_8 : f32 to vector<1x256xf32>
    %26 = arith.select %24, %25, %22 : vector<1x256xi1>, vector<1x256xf32>
    %c2_i32 = arith.constant 2 : i32
    %27 = vector.broadcast %c2_i32 : i32 to vector<1x256xi32>
    %28 = arith.cmpi eq, %3, %27 : vector<1x256xi32>
    %cst_9 = arith.constant 3.000000e-01 : f32
    %29 = vector.broadcast %cst_9 : f32 to vector<1x256xf32>
    %30 = arith.select %28, %29, %26 : vector<1x256xi1>, vector<1x256xf32>
    %c3_i32 = arith.constant 3 : i32
    %31 = vector.broadcast %c3_i32 : i32 to vector<1x256xi32>
    %32 = arith.cmpi eq, %3, %31 : vector<1x256xi32>
    %cst_10 = arith.constant 4.000000e-01 : f32
    %33 = vector.broadcast %cst_10 : f32 to vector<1x256xf32>
    %34 = arith.select %32, %33, %30 : vector<1x256xi1>, vector<1x256xf32>
    %35 = arith.mulf %20, %34 : vector<1x256xf32>
    %cst_11 = arith.constant 1.000000e+00 : f32
    %36 = vector.broadcast %cst_11 : f32 to vector<1x256xf32>
    %37 = arith.subf %36, %21 : vector<1x256xf32>
    %38 = arith.mulf %37, %37 : vector<1x256xf32>
    %cst_12 = arith.constant 0.000000e+00 : f32
    %39 = vector.broadcast %cst_12 : f32 to vector<1x256xf32>
    %40 = arith.subf %39, %38 : vector<1x256xf32>
    %41 = arith.mulf %40, %35 : vector<1x256xf32>
    %42 = tpu.iota {dimensions = array<i32: 1>} : vector<1x256xi32>
    %c256_i32 = arith.constant 256 : i32
    %43 = arith.muli %arg1, %c256_i32 : i32
    %44 = vector.broadcast %43 : i32 to vector<1x256xi32>
    %45 = arith.addi %44, %42 : vector<1x256xi32>
    %c256_i32_13 = arith.constant 256 : i32
    %46 = vector.broadcast %c256_i32_13 : i32 to vector<1x256xi32>
    %47 = arith.cmpi slt, %45, %46 : vector<1x256xi32>
    %cst_14 = arith.constant 0.000000e+00 : f32
    %48 = vector.broadcast %cst_14 : f32 to vector<1x256xf32>
    %49 = arith.select %47, %41, %48 : vector<1x256xi1>, vector<1x256xf32>
    %50 = vector.shape_cast %49 : vector<1x256xf32> to vector<1x1x256xf32>
    %cst_15 = arith.constant dense<0.000000e+00> : vector<1xf32>
    %51 = vector.multi_reduction <add>, %50, %cst_15 [1, 2] : vector<1x1x256xf32> to vector<1xf32>
    %52 = vector.shape_cast %51 : vector<1xf32> to vector<1x1x1xf32>
    %53 = vector.extract %52[0, 0, 0] : f32 from vector<1x1x1xf32>
    %54 = vector.broadcast %53 : f32 to vector<1x1x128xf32>
    %c0_16 = arith.constant 0 : index
    %c0_17 = arith.constant 0 : index
    %c0_18 = arith.constant 0 : index
    %55 = vector.load %arg4[%c0_16, %c0_17, %c0_18] : memref<1x1x128xf32, #tpu.memory_space<vmem>>, vector<1x1x128xf32>
    tpu.vector_store %arg4[%c0_16, %c0_17, %c0_18], %54 {strides = array<i32>} : memref<1x1x128xf32, #tpu.memory_space<vmem>>, vector<1x1x128xf32>,
    return
  }
  func.func @transform_0(%arg0: i32, %arg1: i32) -> (i32, i32, i32) {
    %c0_i32 = arith.constant 0 : i32
    %c0_i32_0 = arith.constant 0 : i32
    return %arg0, %c0_i32, %arg1 : i32, i32, i32
  }
  func.func @transform_1(%arg0: i32, %arg1: i32) -> (i32, i32, i32) {
    %c0_i32 = arith.constant 0 : i32
    %c0_i32_0 = arith.constant 0 : i32
    return %arg0, %c0_i32, %arg1 : i32, i32, i32
  }
  func.func @transform_2(%arg0: i32, %arg1: i32) -> (i32, i32, i32) {
    %c1_i32 = arith.constant 1 : i32
    %0 = arith.muli %arg0, %c1_i32 : i32
    %1 = arith.addi %0, %arg1 : i32
    %c0_i32 = arith.constant 0 : i32
    %c0_i32_0 = arith.constant 0 : i32
    %c0_i32_1 = arith.constant 0 : i32
    return %1, %c0_i32, %c0_i32_0 : i32, i32, i32
  }
}

</mosaic_0001>

<bundles_post_ra>
// kernel: tpu_custom_call.1
= control target key start
LH: loop header
LB: loop body
LE: loop exit
PB: predicated region body
PF: predicated region fallthrough
CT: control target
= control target key end

     0   :  { %7 = vsyncpa [#allocation3], 0  ;;  %s995_s0 = inlined_call_operand.hbm [shape: f32[2,4,256], index: 0, kind: input, shape index: {}]   ;;  %s996_s1 = inlined_call_operand.hbm [shape: s32[2,1,256], index: 1, kind: input, shape index: {}]   ;;  %s997_s2 = inlined_call_operand.hbm [shape: f32[2,1,128], index: 2, kind: output, shape index: {}]  }
   0x1   :  { %9 = vsyncpa [#allocation3 + $0x1], 0 }
   0x2   :  { %10 = vsyncpa [#allocation6], 0 }
   0x3   :  { %12 = vsyncpa [#allocation6 + $0x1], 0 }
   0x4   :  { %13 = vsyncpa [#allocation4], 0 }
   0x5   :  { %15 = vsyncpa [#allocation4 + $0x1], 0  ;;  %s752_s9 = smov 0   ;;  %s754_s10 = smov 0  }
   0x6   :  { %s756_s11 = smov 0   ;;  %s758_s12 = smov 0  }
   0x7   :  { %s760_s13 = smov 0   ;;  %s762_s14 = smov 0  }
   0x8 LB: > { %s482_s15 = sadd.s32 4294967295, %s730_s14   ;;  %s483_s16 = sadd.s32 4294967294, %s730_s14   ;;  %s730_s14 = sphi %s762_s14, %s21_s14   ;;  %s726_s13 = sphi %s760_s13, %s1017_s13   ;;  %s722_s12 = sphi %s758_s12, %s1016_s12   ;;  %s718_s11 = sphi %s756_s11, %s1015_s11   ;;  %s714_s10 = sphi %s754_s10, %s1014_s10   ;;  %s710_s9 = sphi %s752_s9, %s1013_s9  }
   0x9   : > { %s33_s17 = sadd.s32 1, %s726_s13  ;;  %s42_s18 = sadd.s32 1, %s718_s11 }
   0xa   : > { %p35_p0 = scmp.ge.s32.totalorder %s33_s17, 2  ;;  %p49_p1 = scmp.ne.s32.totalorder %s718_s11, %s714_s10 }
   0xb   : > { %p50_p2 = scmp.eq.s32.totalorder %s730_s14, 0  ;;  %p55_p3 = scmp.ne.s32.totalorder %s714_s10, %s710_s9 }
   0xc   : > { %s1019_s17 = smov (%p35_p0, %s33_s17), 0  ;;  %p56_p5 = scmp.eq.s32.totalorder %s482_s15, 0 }
   0xd   : > { %p793_p4 = por %p50_p2, %p49_p1  ;;  %s37_s20 = ssub.s32 %s726_s13, %s1019_s17 }
   0xe   : > { %p109_p6 = scmp.eq.s32.totalorder %s482_s15, 1  ;;  %p40_p7 = scmp.eq.s32.totalorder %s37_s20, 0 }
   0xf   : > { %p799_p8 = por %p56_p5, %p55_p3  ;;  %p115_p10 = scmp.eq.s32.totalorder %s483_s16, 1 }
  0x10   : > { %p803_p9 = por %p109_p6, %p49_p1  ;;  %p521_p13 = scmp.lt.s32.totalorder %s730_s14, 2 }
  0x11   : > { %s1001_s21 = scalar_select %p799_p8, 1, 0 }
  0x12   : > { %s1002_s22 = scalar_select %p803_p9, 1, 0 }
  0x13   : > { %s808_s23 = scalar_select %p40_p7, %s718_s11, %s42_s18  }
  0x14   : > { %p810_p11 = por %p115_p10, %p55_p3  ;;  %s817_s25 = sand.u32 1, %s718_s11  }
  0x15   : > { %s486_s26 = sshll.u32 %s817_s25, 3  ;;  %s500_s27 = sshll.u32 %s726_s13, 7 }
  0x16   : > { %s1003_s24 = scalar_select %p810_p11, 1, 0 }
  0x17   : > { %s824_s30 = scalar_lea.hbm %s995_s0, %s500_s27  ;;  %s139_s3 = scalar_lea.vmem [#allocation2], %s486_s26 }
  0x18   : > { %s149_s4 = sshll.u32 %s139_s3, 4  ;;  %p830_p0 = pnand %p521_p13, %p793_p4  ;;  %s826_s4 = int_to_ptr.vmem [resolvable:$true] %s149_s4 }
  0x19   : > { %s136_s6 = scalar_lea.sflag [#allocation3], %s817_s25  ;;  %s584_s7 = scalar_lea.hbm %s824_s30, 128 }
  0x1a   : > { %p585_p3 = scmp.ne.s32.totalorder %s824_s30, %s584_s7  ;;  %p586_p5 = pneg %p830_p0 }
  0x1b   : > { %s589_s16 = scalar_lea.hbm %s995_s0, 256  ;;  %p590_p4 = scmp.lt.u32.totalorder %s824_s30, %s995_s0 }
  0x1c   : > { %p587_p6 = pnand %p586_p5, %p585_p3  ;;  %p591_p10 = scmp.lt.u32.totalorder %s589_s16, %s584_s7 }
  0x1d   : > { %p593_p12 = scmp.lt.u32.totalorder %s584_s7, %s824_s30 }
  0x1e   : > { %p588_p7 = pneg %p587_p6  ;;  %p592_p13 = por %p591_p10, %p590_p4 }
  0x20   : > { %p594_p1 = por %p593_p12, %p592_p13 }
  0x22   : > { %p595_p2 = pnand %p594_p1, %p588_p7 }
  0x24   : > { %598 = shalt.err (!%p595_p2)
}
  0x25   : > { %s599_s20 = scalar_lea.vmem %s826_s4, 128  ;;  %s732_s26 = smov [#allocation2]  }
  0x26   : > { %p600_p3 = scmp.ne.s32.totalorder %s826_s4, %s599_s20  ;;  %s604_s27 = sshll.u32 %s732_s26, 4  ;;  %s605_s27 = int_to_ptr.vmem [resolvable:$false] %s604_s27 }
  0x27   : > { %s606_s28 = scalar_lea.vmem %s605_s27, 256  ;;  %p607_p9 = scmp.lt.s32.totalorder %s826_s4, %s605_s27 }
  0x28   : > { %p602_p6 = pnand %p600_p3, %p586_p5  ;;  %p608_p4 = scmp.lt.s32.totalorder %s606_s28, %s599_s20 }
  0x2a   : > { %p603_p11 = pneg %p602_p6  ;;  %p609_p10 = por %p608_p4, %p607_p9 }
  0x2c   : > { %p610_p12 = pnand %p609_p10, %p603_p11 }
  0x2e   : > { %613 = shalt.err (!%p610_p12)
}
  0x2f   : > { %513 = dma.hbm_to_vmem [thread:$0]  (!%p830_p0), %s824_s30, 128, %s826_s4, %s136_s6  }
  0x30   : > { %p1005_p1 = scmp.lt.s32.totalorder %s730_s14, 3  ;;  %p1006_p2 = scmp.ge.s32.totalorder %s730_s14, 1 }
  0x31   : > { %s489_s3 = sshll.u32 %s817_s25, 1  ;;  %s501_s7 = sshll.u32 %s726_s13, 5 }
  0x32   : > { %p866_p7 = pnand %p1006_p2, %p1005_p1  ;;  %s875_s16 = scalar_lea.hbm %s996_s1, %s501_s7 }
  0x33   : > { %s160_s18 = scalar_lea.vmem [#allocation5], %s489_s3  ;;  %s157_s30 = scalar_lea.sflag [#allocation6], %s817_s25 }
  0x34   : > { %s1007_s29 = scalar_select %p866_p7, 1, 0 }
  0x35   : > { %s170_s19 = sshll.u32 %s160_s18, 4  ;;  %s614_s4 = scalar_lea.hbm %s875_s16, 32  ;;  %s171_s19 = int_to_ptr.vmem [resolvable:$true] %s170_s19 }
  0x36   : > { %p615_p9 = scmp.ne.s32.totalorder %s875_s16, %s614_s4  ;;  %s619_s26 = scalar_lea.hbm %s996_s1, 64 }
  0x37   : > { %p620_p3 = scmp.lt.u32.totalorder %s875_s16, %s996_s1  ;;  %p621_p6 = scmp.lt.u32.totalorder %s619_s26, %s614_s4 }
  0x38   : > { %p617_p11 = pnand %p615_p9, %p586_p5  ;;  %p623_p10 = scmp.lt.u32.totalorder %s614_s4, %s875_s16 }
  0x39   : > { %p622_p4 = por %p621_p6, %p620_p3 }
  0x3a   : > { %p618_p13 = pneg %p617_p11 }
  0x3b   : > { %p624_p12 = por %p623_p10, %p622_p4 }
  0x3d   : > { %p625_p1 = pnand %p624_p12, %p618_p13 }
  0x3f   : > { %628 = shalt.err (!%p625_p1)
}
  0x40   : > { %s629_s25 = scalar_lea.vmem %s171_s19, 32  ;;  %s733_s3 = smov [#allocation5]  }
  0x41   : > { %p630_p2 = scmp.ne.s32.totalorder %s171_s19, %s629_s25  ;;  %s634_s7 = sshll.u32 %s733_s3, 4  ;;  %s635_s7 = int_to_ptr.vmem [resolvable:$false] %s634_s7 }
  0x42   : > { %s636_s8 = scalar_lea.vmem %s635_s7, 64  ;;  %p637_p8 = scmp.lt.s32.totalorder %s171_s19, %s635_s7 }
  0x43   : > { %p632_p9 = pnand %p630_p2, %p586_p5  ;;  %p638_p7 = scmp.lt.s32.totalorder %s636_s8, %s629_s25 }
  0x45   : > { %p633_p11 = pneg %p632_p9  ;;  %p639_p3 = por %p638_p7, %p637_p8 }
  0x47   : > { %p640_p6 = pnand %p639_p3, %p633_p11 }
  0x49   : > { %643 = shalt.err (!%p640_p6)
}
  0x4a   : > { %516 = dma.hbm_to_vmem [thread:$0]  (!%p830_p0), %s875_s16, 32, %s171_s19, %s157_s30  }
  0x4b   : > { %p1008_p13 = scmp.ne.s32.totalorder %s1007_s29, 0 }
  0x4c   : > { %s900_s15 = sand.u32 (!%p1008_p13), 1, %s714_s10   ;;  %p1009_p5 = scmp.ne.s32.totalorder (!%p1008_p13), %s1001_s21, 0 }
  0x4d   : > { %179 = sbr.rel (%p1008_p13) target bundleno = 394 (0x18a), region = 28  ;;  %s493_s18 = sshll.u32 (!%p1008_p13), %s900_s15, 3 }
  0x4e   : > { %s182_s4 = scalar_lea.sflag (!%p1008_p13), [#allocation3], %s900_s15  ;;  %s185_s6 = scalar_lea.vmem (!%p1008_p13), [#allocation2], %s493_s18 }
  0x54   : > { %697 = dma.done.wait (%p1009_p5), %s182_s4, 128  }
  0x55   : > { %699 = vsyncadd (%p1009_p5), %s182_s4, 4294967168  ;;  %s494_s5 = sshll.u32 %s900_s15, 1  ;;  %s191_s29 = scalar_lea.sflag [#allocation6], %s900_s15 }
  0x56   : > { %s194_s16 = scalar_lea.vmem [#allocation5], %s494_s5 }
  0x57   : > { %701 = dma.done.wait (%p1009_p5), %s191_s29, 32  }
  0x58   : > { %703 = vsyncadd (%p1009_p5), %s191_s29, 4294967264  ;;  %vm227_vm0 = vcmask 1043456   ;;  %v222_v0 = vld [vmem:[%s185_s6] sm:$0xff]  ;;  %v270_v9 = vlaneseq  ;;  %v919_v19 = vld [vmem:[%s194_s16] sm:$0x3]  ;;  %v734_v26 = vmov 0.0  }
  0x59   : > { %v225_v1 = vcombine.high %v222_v0, %v222_v0  ;;  %v228_v2 = vsel %vm227_vm0, %v222_v0, -inf  ;;  %vm311_vm3 = vcmp.eq.s32.totalorder %v919_v19, 1  ;;  %vm313_vm4 = vcmp.eq.s32.totalorder %v919_v19, 2  ;;  %s218_s21 = scalar_lea.vmem [#allocation7], %s900_s15  ;;  %s497_s30 = sshll.u32 %s722_s12, 4 }
  0x5a   : > { %v229_v3 = vrot.slane %v228_v2, 4  ;;  %v916_v14 = vshrl.u32 %v270_v9, 7  ;;  %vm315_vm5 = vcmp.eq.s32.totalorder %v919_v19, 3  ;;  %vm349_vm6 = vcmask 1040384   ;;  %s378_s19 = sshll.u32 %s218_s21, 4  ;;  %s948_s28 = scalar_lea.hbm %s997_s2, %s497_s30  ;;  %s943_s19 = int_to_ptr.vmem [resolvable:$true] %s378_s19 }
  0x5b   : > { %v235_v4 = vsel %vm227_vm0, %v225_v1, -inf  ;;  %s365_s25 = scalar_lea.sflag [#allocation4], %s900_s15  ;;  %s644_s3 = scalar_lea.vmem %s943_s19, 16 }
  0x5c   : > { %v230_v5 = vmax.f32 %v228_v2, %v229_v3  ;;  %v236_v6 = vrot.slane %v235_v4, 4  ;;  %v274_v18 = vsub.s32 0, %v916_v14  ;;  %v278_v21 = vsub.s32 1, %v916_v14  ;;  %p645_p8 = scmp.ne.s32.totalorder %s943_s19, %s644_s3  ;;  %p1010_p0 = scmp.ne.s32.totalorder %s1002_s22, 0 }
  0x5d   : > { %s736_s12 = smov [#allocation7]  }
  0x5e   : > { %v231_v7 = vrot.slane %v230_v5, 2  ;;  %v237_v8 = vmax.f32 %v235_v4, %v236_v6  ;;  %v275_v23 = vrot.slane %v919_v19, %v274_v18  ;;  %v279_v25 = vrot.slane %v919_v19, %v278_v21  ;;  %p646_p7 = pnand %p645_p8, %p1010_p0  ;;  %s648_s7 = sshll.u32 %s736_s12, 4  ;;  %s649_s7 = int_to_ptr.vmem [resolvable:$false] %s648_s7 }
  0x5f   : > { %v735_v6 = vmov 0.1   ;;  %s650_s8 = scalar_lea.vmem %s649_s7, 32  ;;  %p651_p10 = scmp.lt.s32.totalorder %s943_s19, %s649_s7 }
  0x60   : > { %v232_v10 = vmax.f32 %v230_v5, %v231_v7  ;;  %v238_v11 = vrot.slane %v237_v8, 2  ;;  %vm280_vm1 = vcmp.eq.s32.totalorder %v916_v14, %v275_v23  ;;  %vm281_vm2 = vcmp.eq.s32.totalorder %v916_v14, %v279_v25  ;;  %p647_p4 = pneg %p646_p7  ;;  %p652_p12 = scmp.lt.s32.totalorder %s650_s8, %s644_s3 }
  0x61   : > { %v495_v27 = vsel %vm280_vm1, 1.0, %v734_v26  ;;  %v496_v29 = vsel %vm281_vm2, 1.0, %v734_v26  ;;  %v312_v7 = vsel %vm311_vm3, 0.2, %v735_v6 }
  0x62   : > { %v233_v12 = vrot.slane %v232_v10, 1  ;;  %v239_v13 = vmax.f32 %v237_v8, %v238_v11  ;;  %v314_v8 = vsel %vm313_vm4, 0.3, %v312_v7  ;;  %p653_p1 = por %p652_p12, %p651_p10 }
  0x63   : > { %v316_v9 = vsel %vm315_vm5, 0.4, %v314_v8 }
  0x64   : > { %v234_v15 = vmax.f32 %v232_v10, %v233_v12  ;;  %v240_v16 = vrot.slane %v239_v13, 1  ;;  %v321_v10 = vrot.slane %v316_v9, %v274_v18  ;;  %v325_v12 = vrot.slane %v316_v9, %v278_v21  ;;  %p654_p2 = pnand %p653_p1, %p647_p4 }
  0x66   : > { %v241_v17 = vmax.f32 %v239_v13, %v240_v16 }
  0x68   : > { %v244_v20 = vcombine.low %v234_v15, %v241_v17 }
  0x6a   : > { %v246_v22 = vsub.f32 %v222_v0, %v244_v20 }
  0x6c   : > { %v247_v24 = vmul.f32 1.442695, %v246_v22  ;;  %v287_v28 = vcombine.high %v246_v22, %v246_v22  ;;  %v289_v30 = vmul.f32 %v495_v27, %v246_v22 }
  0x6e   : > { %574 = vpow2.f32 %v247_v24  ;;  %v290_v31 = vmul.f32 %v496_v29, %v287_v28  ;;  %v291_v33 = vsel %vm227_vm0, %v289_v30, 0.0 }
  0x6f   : > { %v292_v39 = vrot.slane %v291_v33, 4 }
  0x70   : > { %v298_v37 = vsel %vm227_vm0, %v290_v31, 0.0 }
  0x71   : > { %v299_v42 = vrot.slane %v298_v37, 4  ;;  %v293_v45 = vadd.f32 %v292_v39, %v291_v33 }
  0x73   : > { %v300_v48 = vadd.f32 %v299_v42, %v298_v37  ;;  %v294_v51 = vrot.slane %v293_v45, 2 }
  0x75   : > { %v301_v54 = vrot.slane %v300_v48, 2  ;;  %v295_v56 = vadd.f32 %v294_v51, %v293_v45 }
  0x77   : > { %v302_v57 = vadd.f32 %v301_v54, %v300_v48  ;;  %v296_v58 = vrot.slane %v295_v56, 1 }
  0x78   : > { %v575_v32 = vpop.eup %574 }
  0x79   : > { %v250_v34 = vcombine.high %v575_v32, %v575_v32  ;;  %v252_v35 = vsel %vm227_vm0, %v575_v32, 0.0  ;;  %v303_v59 = vrot.slane %v302_v57, 1  ;;  %v297_v60 = vadd.f32 %v296_v58, %v295_v56 }
  0x7a   : > { %v253_v36 = vrot.slane %v252_v35, 4 }
  0x7b   : > { %v259_v38 = vsel %vm227_vm0, %v250_v34, 0.0  ;;  %v304_v63 = vadd.f32 %v303_v59, %v302_v57 }
  0x7c   : > { %v254_v40 = vadd.f32 %v253_v36, %v252_v35  ;;  %v260_v41 = vrot.slane %v259_v38, 4 }
  0x7e   : > { %v255_v43 = vrot.slane %v254_v40, 2  ;;  %v261_v44 = vadd.f32 %v260_v41, %v259_v38 }
  0x80   : > { %v256_v46 = vadd.f32 %v255_v43, %v254_v40  ;;  %v262_v47 = vrot.slane %v261_v44, 2 }
  0x82   : > { %v257_v49 = vrot.slane %v256_v46, 1  ;;  %v263_v50 = vadd.f32 %v262_v47, %v261_v44 }
  0x84   : > { %v258_v52 = vadd.f32 %v257_v49, %v256_v46  ;;  %v264_v53 = vrot.slane %v263_v50, 1 }
  0x86   : > { %v265_v55 = vadd.f32 %v264_v53, %v263_v50  ;;  %576 = vlog2.f32 %v258_v52 }
  0x88   : > { %578 = vlog2.f32 %v265_v55 }
  0x90   : > { %v577_v61 = vpop.eup %576 }
  0x91   : > { %v267_v62 = vmul.f32 0.6931472, %v577_v61 }
  0x92   : > { %v579_v0 = vpop.eup %578 }
  0x93   : > { %v269_v1 = vmul.f32 0.6931472, %v579_v0  ;;  %v305_v2 = vsub.f32 %v297_v60, %v267_v62 }
  0x95   : > { %v306_v3 = vsub.f32 %v304_v63, %v269_v1  ;;  %v307_v4 = vmul.f32 1.442695, %v305_v2  ;;  %v328_v16 = vmul.f32 %v321_v10, %v305_v2 }
  0x97   : > { %580 = vpow2.f32 %v307_v4  ;;  %v309_v5 = vmul.f32 1.442695, %v306_v3  ;;  %v329_v22 = vmul.f32 %v325_v12, %v306_v3 }
  0x99   : > { %582 = vpow2.f32 %v309_v5 }
  0xa1   : > { %v581_v11 = vpop.eup %580 }
  0xa2   : > { %v330_v13 = vsub.f32 1.0, %v581_v11 }
  0xa3   : > { %v583_v15 = vpop.eup %582 }
  0xa4   : > { %v331_v17 = vsub.f32 1.0, %v583_v15  ;;  %v332_v20 = vmul.f32 %v330_v13, %v330_v13 }
  0xa6   : > { %v333_v23 = vmul.f32 %v331_v17, %v331_v17  ;;  %v334_v24 = vsub.f32 0.0, %v332_v20 }
  0xa8   : > { %v335_v25 = vsub.f32 0.0, %v333_v23  ;;  %v336_v19 = vmul.f32 %v334_v24, %v328_v16 }
  0xaa   : > { %v337_v26 = vmul.f32 %v335_v25, %v329_v22  ;;  %v350_v27 = vsel %vm349_vm6, %v336_v19, 0.0 }
  0xac   : > { %v351_v18 = vsel %vm349_vm6, %v337_v26, 0.0 }
  0xad   : > { %v352_v28 = vadd.f32 %v351_v18, %v350_v27 }
  0xaf   : > { %353 = vadd.xlane.f32.xlu0 %v352_v28 }
 0x13c   : > { %v354_v14 = vpop.xlane.xlu0 %353 }
 0x13d   : > { %v355_v21 = vrot.slane %v354_v14, 4 }
 0x13f   : > { %v356_v29 = vadd.f32 %v355_v21, %v354_v14 }
 0x141   : > { %v357_v30 = vrot.slane %v356_v29, 2 }
 0x143   : > { %v358_v31 = vadd.f32 %v357_v30, %v356_v29 }
 0x145   : > { %v359_v32 = vrot.slane %v358_v31, 1 }
 0x147   : > { %v360_v33 = vadd.f32 %v359_v32, %v358_v31 }
 0x149   : > { %502 = vpush %v360_v33 }
 0x17a   : > { %s503_s20 = spop %502 }
 0x17b   : > { %v362_v34 = vstv %s503_s20 }
 0x17c   : > { %363 = vst [vmem:[%s218_s21] sm:$0x1] %v362_v34 }
 0x17d   : > { %657 = shalt.err (!%p654_p2)
}
 0x17e   : > { %s658_s15 = scalar_lea.hbm %s948_s28, 16  ;;  %s662_s6 = scalar_lea.hbm %s997_s2, 32 }
 0x17f   : > { %p659_p9 = scmp.ne.s32.totalorder %s948_s28, %s658_s15  ;;  %p663_p6 = scmp.lt.u32.totalorder %s948_s28, %s997_s2 }
 0x180   : > { %p664_p13 = scmp.lt.u32.totalorder %s662_s6, %s658_s15  ;;  %p666_p8 = scmp.lt.u32.totalorder %s658_s15, %s948_s28 }
 0x181   : > { %p660_p11 = pnand %p659_p9, %p1010_p0 }
 0x182   : > { %p665_p5 = por %p664_p13, %p663_p6 }
 0x183   : > { %p661_p3 = pneg %p660_p11 }
 0x184   : > { %p667_p7 = por %p666_p8, %p665_p5 }
 0x186   : > { %p668_p4 = pnand %p667_p7, %p661_p3 }
 0x188   : > { %671 = shalt.err (!%p668_p4)
}
 0x189   : > { %508 = dma.vmem_to_hbm [thread:$0]  (%p1010_p0), %s943_s19, 16, %s948_s28, %s365_s25  }
 0x18a PF: > { %s390_s16 = sand.u32 1, %s710_s9   ;;  %p1011_p10 = scmp.ne.s32.totalorder %s1003_s24, 0 }
 0x18b   : > { %p1012_p12 = scmp.ge.s32.totalorder %s730_s14, 2  ;;  %s391_s21 = scalar_lea.sflag [#allocation4], %s390_s16 }
 0x18d   : > { %p518_p1 = pnand %p1012_p12, %p1011_p10 }
 0x18f   : > { %705 = dma.done.wait (!%p518_p1), %s391_s21, 16  }
 0x190   : > { %707 = vsyncadd (!%p518_p1), %s391_s21, 4294967280  ;;  %s21_s14 = sadd.s32 1, %s730_s14   ;;  %s1013_s9 = smov %s714_s10 }
 0x191   : > { %p18_p2 = scmp.ge.s32.totalorder %s21_s14, 4   ;;  %s1014_s10 = smov %s718_s11 }
 0x192   : > { %s1015_s11 = smov %s808_s23  ;;  %s1016_s12 = smov %s726_s13 }
 0x193   : > { %s1017_s13 = smov %s1019_s17  ;;  %20 = sbr.rel (!%p18_p2) target bundleno = 8 (0x8), region = 86 }
 0x19a   :  { %395 = vsyncpa [#allocation3], 1 }
 0x19b   :  { %397 = vsyncpa [#allocation3 + $0x1], 1 }
 0x19c   :  { %398 = vsyncpa [#allocation6], 1 }
 0x19d   :  { %400 = vsyncpa [#allocation6 + $0x1], 1 }
 0x19e   :  { %401 = vsyncpa [#allocation4], 1 }
 0x19f   :  { %403 = vsyncpa [#allocation4 + $0x1], 1 }

</bundles_post_ra>
